<compile_context>
chip_gen: v7x
topology: tpu7x:2x2x1
jax: 0.10.0
libtpu: 0.0.40
codegen_flags: <defaults>
</compile_context>

<pallas_src>
import jax
import jax.numpy as jnp
import numpy as np
from jax.experimental import pallas as pl
from jax.experimental.pallas import tpu as pltpu


# ----------------------------- kernels ---------------------------------------------------

def _pos_emb_slice_kernel(w_ref, o_ref):
    # (1, tile, E) VMEM tile of the table -> output.  Pure copy (DMA-bound).
    o_ref[...] = w_ref[...]


def _pos_emb_add_kernel(x_ref, w_ref, o_ref):
    # Fused consumer: o = x + pos_emb.  (1, tile, E) tiles.
    o_ref[...] = x_ref[...].astype(o_ref.dtype) + w_ref[...].astype(o_ref.dtype)


# ----------------------------- tiling helpers --------------------------------------------

def _round_up(x: int, m: int) -> int:
    return ((x + m - 1) // m) * m


def _sublane_for(dtype) -> int:
    # Sublane pack per dtype: 8 rows f32, 16 rows bf16/f16, 32 rows int8/fp8.
    return {4: 8, 2: 16, 1: 32}.get(jnp.dtype(dtype).itemsize, 8)


def _pick_seq_tile(padded_seq: int, embed: int, itemsize: int, sublane: int) -> int:
    """Pick a seq tile: sublane-aligned, divides padded_seq, ~<=1 MiB per block,
    and leaves >=2 grid steps when possible (v7x 2-TC sharding, DMA overlap)."""
    if padded_seq % sublane != 0:
        # Rare fallback (max_len itself not sublane-aligned): full-extent block is legal.
        return padded_seq
    bytes_per_row = embed * itemsize
    target_bytes = 1 << 20  # ~1 MiB/block; 2 operands x 2 pipeline bufs ~= 4 MiB total
    rows_by_bytes = max(sublane, (target_bytes // max(bytes_per_row, 1)) // sublane * sublane)
    if padded_seq >= 2 * sublane:
        rows_cap = max(sublane, (padded_seq // 2) // sublane * sublane)
    else:
        rows_cap = padded_seq
    tile = min(rows_by_bytes, rows_cap, padded_seq)
    tile = max(sublane, (tile // sublane) * sublane)
    while tile > sublane and padded_seq % tile != 0:
        tile -= sublane
    return tile


# ----------------------------- wrappers ---------------------------------------------------

def positional_embedding_forward(weight: jax.Array, seq_len: int) -> jax.Array:
    """weight: (1, max_len, E) -> (1, seq_len, E), equal to weight[:, :seq_len, :]."""
    _, max_len, E = weight.shape
    assert seq_len <= max_len, "sequence longer than max_len"
    dtype = weight.dtype
    sublane = _sublane_for(dtype)

    # Round the kernel extent up to the sublane pack so blocks satisfy the (8,128)
    # rule and stores are unmasked; never read past the table.
    padded_seq = min(_round_up(seq_len, sublane), max_len)
    tile = _pick_seq_tile(padded_seq, E, jnp.dtype(dtype).itemsize, sublane)
    grid = (padded_seq // tile,)

    out_padded = pl.pallas_call(
        _pos_emb_slice_kernel,
        out_shape=jax.ShapeDtypeStruct((1, padded_seq, E), dtype),
        grid=grid,
        in_specs=[pl.BlockSpec((1, tile, E), lambda i: (0, i, 0))],   # only needed rows DMA'd
        out_specs=pl.BlockSpec((1, tile, E), lambda i: (0, i, 0)),
        compiler_params=pltpu.CompilerParams(
            dimension_semantics=("parallel",)),                        # v7x: both TCs usable
    )(weight)

    if padded_seq != seq_len:
        out_padded = out_padded[:, :seq_len, :]
    return out_padded


def add_positional_embedding(x: jax.Array, weight: jax.Array) -> jax.Array:
    """Fused consumer path (perf-review suggestion): x + weight[:, :x.shape[1], :].

    Each weight tile is DMA'd once per seq-tile and reused across the batch grid axis;
    the (1, seq, E) intermediate never hits HBM.
    """
    B, seq_len, E = x.shape
    _, max_len, Ew = weight.shape
    assert E == Ew and seq_len <= max_len
    out_dtype = jnp.result_type(x.dtype, weight.dtype)
    sublane = max(_sublane_for(x.dtype), _sublane_for(weight.dtype), _sublane_for(out_dtype))

    padded_seq = _round_up(seq_len, sublane)
    x_p = x if padded_seq == seq_len else jnp.pad(
        x, ((0, 0), (0, padded_seq - seq_len), (0, 0)))
    w_p = weight if padded_seq <= max_len else jnp.pad(
        weight, ((0, 0), (0, padded_seq - max_len), (0, 0)))

    tile = _pick_seq_tile(padded_seq, E, jnp.dtype(out_dtype).itemsize, sublane)
    grid = (B, padded_seq // tile)

    out_padded = pl.pallas_call(
        _pos_emb_add_kernel,
        out_shape=jax.ShapeDtypeStruct((B, padded_seq, E), out_dtype),
        grid=grid,
        in_specs=[
            pl.BlockSpec((1, tile, E), lambda b, i: (b, i, 0)),        # x
            pl.BlockSpec((1, tile, E), lambda b, i: (0, i, 0)),        # weight: batch-invariant
        ],
        out_specs=pl.BlockSpec((1, tile, E), lambda b, i: (b, i, 0)),
        compiler_params=pltpu.CompilerParams(
            dimension_semantics=("parallel", "parallel")),
    )(x_p, w_p)

    if padded_seq != seq_len:
        out_padded = out_padded[:, :seq_len, :]
    return out_padded


class LearnablePositionalEmbeddingPallas:
    """JAX/Pallas port of the PyTorch LearnablePositionalEmbedding (forward only)."""

    def __init__(self, key, embedding_size: int, max_len: int = 512, dtype=jnp.float32):
        # pe = 0.1 * randn(max_len, embedding_size); unsqueeze(0) -> (1, max_len, E)
        self.weight = (0.1 * jax.random.normal(
            key, (1, max_len, embedding_size), jnp.float32)).astype(dtype)

    def __call__(self, x: jax.Array) -> jax.Array:
        seq_len = x.shape[1]          # Dim.seq
        return positional_embedding_forward(self.weight, seq_len)


# TODO(synk): training-mode parameter updates (requires_grad) are outside the scope of
# this forward-pass kernel; only the forward slice (and an optional fused add) is implemented.


# ----------------------------- main ------------------------------------------------------

if __name__ == "__main__":
    key = jax.random.PRNGKey(0)
    k_weight, k_x = jax.random.split(key, 2)

    batch, seq, embedding_size, max_len = 2, 8, 128, 512

    module = LearnablePositionalEmbeddingPallas(k_weight, embedding_size, max_len=max_len)
    x = jax.random.normal(k_x, (batch, seq, embedding_size), jnp.float32)

    # 1) Module forward (spec semantics): weight[:, :seq, :]
    out = jax.block_until_ready(module(x))
    ref = jax.block_until_ready(module.weight[:, :seq, :])
    assert out.shape == (1, seq, embedding_size), out.shape
    np.testing.assert_allclose(np.asarray(out), np.asarray(ref), rtol=0.0, atol=0.0)

    # 2) Irregular seq_len path (padding + wrapper slice keeps blocks (8,128)-legal)
    seq_irr = 13
    out_irr = jax.block_until_ready(positional_embedding_forward(module.weight, seq_irr))
    ref_irr = jax.block_until_ready(module.weight[:, :seq_irr, :])
    assert out_irr.shape == (1, seq_irr, embedding_size), out_irr.shape
    np.testing.assert_allclose(np.asarray(out_irr), np.asarray(ref_irr), rtol=0.0, atol=0.0)

    # 3) Fused consumer kernel: x + weight[:, :seq, :]
    out_add = jax.block_until_ready(add_positional_embedding(x, module.weight))
    ref_add = jax.block_until_ready(x + module.weight[:, :seq, :])
    assert out_add.shape == (batch, seq, embedding_size), out_add.shape
    np.testing.assert_allclose(np.asarray(out_add), np.asarray(ref_add), rtol=0.0, atol=0.0)

    print("KERNEL_OK")
</pallas_src>

<mosaic_0001>
module attributes {stable_mosaic.version = 11 : i64} {
  func.func @_pos_emb_slice_kernel(%arg0: i32, %arg1: memref<1x8x128xf32, #tpu.memory_space<vmem>>, %arg2: memref<1x8x128xf32, #tpu.memory_space<vmem>>) attributes {dimension_semantics = [#tpu.dimension_semantics<parallel>], iteration_bounds = array<i64: 1>, scalar_prefetch = 0 : i64, scratch_operands = 0 : i64, tpu.core_type = #tpu.core_type<tc>, window_params = [{transform_indices = @transform_0, window_bounds = array<i64: 1, 8, 128>}, {transform_indices = @transform_1, window_bounds = array<i64: 1, 8, 128>}]} {
    %c0 = arith.constant 0 : index
    %c0_0 = arith.constant 0 : index
    %c0_1 = arith.constant 0 : index
    %0 = vector.load %arg1[%c0, %c0_0, %c0_1] : memref<1x8x128xf32, #tpu.memory_space<vmem>>, vector<1x8x128xf32>
    %c0_2 = arith.constant 0 : index
    %c0_3 = arith.constant 0 : index
    %c0_4 = arith.constant 0 : index
    %1 = vector.load %arg2[%c0_2, %c0_3, %c0_4] : memref<1x8x128xf32, #tpu.memory_space<vmem>>, vector<1x8x128xf32>
    tpu.vector_store %arg2[%c0_2, %c0_3, %c0_4], %0 {strides = array<i32>} : memref<1x8x128xf32, #tpu.memory_space<vmem>>, vector<1x8x128xf32>,
    return
  }
  func.func @transform_0(%arg0: i32) -> (i32, i32, i32) {
    %c0_i32 = arith.constant 0 : i32
    %c0_i32_0 = arith.constant 0 : i32
    %c0_i32_1 = arith.constant 0 : i32
    return %c0_i32, %arg0, %c0_i32_0 : i32, i32, i32
  }
  func.func @transform_1(%arg0: i32) -> (i32, i32, i32) {
    %c0_i32 = arith.constant 0 : i32
    %c0_i32_0 = arith.constant 0 : i32
    %c0_i32_1 = arith.constant 0 : i32
    return %c0_i32, %arg0, %c0_i32_0 : i32, i32, i32
  }
}

</mosaic_0001>

<bundles_post_ra>
// kernel: tpu_custom_call.1
= control target key start
LH: loop header
LB: loop body
LE: loop exit
PB: predicated region body
PF: predicated region fallthrough
CT: control target
= control target key end

     0   :  { %6 = vsyncpa [#allocation3], 0  ;;  %s127_s0 = inlined_call_operand.hbm [shape: f32[1,512,128], index: 0, kind: input, shape index: {}]   ;;  %s128_s1 = inlined_call_operand.hbm [shape: f32[1,8,128], index: 1, kind: output, shape index: {}]  }
   0x1   :  { %7 = vsyncpa [#allocation4], 0  ;;  %s88_s6 = smov [#allocation2]   ;;  %s40_s10 = scalar_lea.hbm %s127_s0, 128 }
   0x2   :  { %s14_s7 = sshll.u32 %s88_s6, 4  ;;  %p41_p0 = scmp.ne.s32.totalorder %s127_s0, %s40_s10  ;;  %s15_s7 = int_to_ptr.vmem [resolvable:$true] %s14_s7 }
   0x3   :  { %s42_s15 = scalar_lea.hbm %s127_s0, 8192  ;;  %p44_p2 = scmp.lt.u32.totalorder %s40_s10, %s127_s0 }
   0x4   :  { %p43_p1 = scmp.lt.u32.totalorder %s42_s15, %s40_s10 }
   0x6   :  { %p45_p3 = por %p44_p2, %p43_p1 }
   0x8   :  { %p46_p4 = pnand %p45_p3, %p41_p0 }
   0xa   :  { %49 = shalt.err (!%p46_p4)
}
   0xb   :  { %s50_s18 = scalar_lea.vmem %s15_s7, 128  ;;  %p55_p6 = scmp.lt.s32.totalorder %s15_s7, %s15_s7 }
   0xc   :  { %p51_p5 = scmp.ne.s32.totalorder %s15_s7, %s50_s18  ;;  %p56_p7 = scmp.lt.s32.totalorder %s50_s18, %s50_s18 }
   0xe   :  { %p57_p8 = por %p56_p7, %p55_p6 }
  0x10   :  { %p58_p9 = pnand %p57_p8, %p51_p5 }
  0x12   :  { %61 = shalt.err (!%p58_p9)
}
  0x13   :  { %17 = dma.hbm_to_vmem [thread:$0]  %s127_s0, 128, %s15_s7, [#allocation3]  }
  0x14   :  { %84 = dma.done.wait [#allocation3], 128  }
  0x15   :  { %85 = vsyncadd [#allocation3], 4294967168  ;;  %s89_s21 = smov [#allocation5]   ;;  %v21_v0 = vld [vmem:[#allocation2] sm:$0xff] }
  0x16   :  { %s29_s22 = sshll.u32 %s89_s21, 4  ;;  %22 = vst [vmem:[#allocation5] sm:$0xff] %v21_v0  ;;  %s30_s22 = int_to_ptr.vmem [resolvable:$true] %s29_s22 }
  0x17   :  { %s62_s23 = scalar_lea.vmem %s30_s22, 128  ;;  %p67_p11 = scmp.lt.s32.totalorder %s30_s22, %s30_s22 }
  0x18   :  { %p63_p10 = scmp.ne.s32.totalorder %s30_s22, %s62_s23  ;;  %p68_p12 = scmp.lt.s32.totalorder %s62_s23, %s62_s23 }
  0x1a   :  { %p69_p13 = por %p68_p12, %p67_p11 }
  0x1c   :  { %p70_p0 = pnand %p69_p13, %p63_p10 }
  0x1e   :  { %73 = shalt.err (!%p70_p0)
}
  0x1f   :  { %s74_s26 = scalar_lea.hbm %s128_s1, 128 }
  0x20   :  { %p75_p1 = scmp.ne.s32.totalorder %s128_s1, %s74_s26  ;;  %p78_p2 = scmp.lt.u32.totalorder %s74_s26, %s128_s1 }
  0x22   :  { %p80_p3 = pnand %p78_p2, %p75_p1 }
  0x24   :  { %83 = shalt.err (!%p80_p3)
}
  0x25   :  { %32 = dma.vmem_to_hbm [thread:$0]  %s30_s22, 128, %s128_s1, [#allocation4]  }
  0x26   :  { %86 = dma.done.wait [#allocation4], 128  }
  0x27   :  { %87 = vsyncadd [#allocation4], 4294967168 }
  0x28   :  { %36 = vsyncpa [#allocation3], 1 }
  0x29   :  { %37 = vsyncpa [#allocation4], 1 }

</bundles_post_ra>
